<compile_context>
chip_gen: v7x
topology: tpu7x:2x2x1
jax: 0.10.0
libtpu: 0.0.40
codegen_flags: <defaults>
</compile_context>

<pallas_src>
import functools

import jax
import jax.numpy as jnp
from jax import lax
from jax.experimental import pallas as pl
from jax.experimental.pallas import tpu as pltpu


# ------------------------------ in-kernel bodies ------------------------------
def _cross_entropy_body(logits, labels):
    """Mean NLL.  logits: (N, C) f32, labels: (N, 1) i32 (VMEM column)."""
    logits = logits.astype(jnp.float32)
    n, c = logits.shape
    m = jnp.max(logits, axis=1, keepdims=True)
    lse = jnp.log(jnp.sum(jnp.exp(logits - m), axis=1, keepdims=True)) + m  # (N,1)
    col = lax.broadcasted_iota(jnp.int32, (n, c), 1)
    picked = jnp.sum(jnp.where(col == labels, logits, 0.0), axis=1, keepdims=True)
    return jnp.sum(lse - picked) / float(n)


def _mmd_rbf_body(total, batch, kernel_mul, kernel_num):
    """RBF MMD of stacked features total=(2B, D), source rows first."""
    total = total.astype(jnp.float32)
    n = total.shape[0]

    # Pairwise squared L2 via Gram matrix on the MXU: l2_ij = g_ii + g_jj - 2 g_ij
    gram = lax.dot_general(
        total, total,
        dimension_numbers=(((1,), (1,)), ((), ())),   # total @ total.T
        preferred_element_type=jnp.float32,
    )  # (n, n)
    row = lax.broadcasted_iota(jnp.int32, (n, n), 0)
    col = lax.broadcasted_iota(jnp.int32, (n, n), 1)
    diag = jnp.where(row == col, gram, 0.0)
    sq_i = jnp.sum(diag, axis=1, keepdims=True)   # (n, 1): gram[i, i]
    sq_j = jnp.sum(diag, axis=0, keepdims=True)   # (1, n): gram[j, j]
    l2 = jnp.maximum(sq_i + sq_j - 2.0 * gram, 0.0)

    # Bandwidth heuristic (fix_sigma=None path of the torch reference).
    bandwidth = jnp.sum(l2) / float(n * n - n)
    bandwidth = bandwidth / (kernel_mul ** (kernel_num // 2))

    if kernel_mul == 2.0:
        # exp once at the widest bandwidth; narrower kernels by repeated squaring:
        # exp(-l2/(bw*2^(i-1))) = exp(-l2/(bw*2^i))^2
        e = jnp.exp(-l2 / (bandwidth * (kernel_mul ** (kernel_num - 1))))
        kernels = e
        for _ in range(kernel_num - 1):
            e = e * e
            kernels = kernels + e
    else:
        kernels = jnp.zeros_like(l2)
        for i in range(kernel_num):
            kernels = kernels + jnp.exp(-l2 / (bandwidth * (kernel_mul ** i)))

    # Single signed quadrant reduction: +1 on XX/YY blocks, -1 on XY/YX blocks.
    rs = row < batch
    cs = col < batch
    sign = jnp.where(rs == cs, 1.0, -1.0)
    return jnp.sum(sign * kernels) / float(batch * batch)


def _muti_loss_kernel(clf_logits_ref, clf_labels_ref,
                      eog_logits_ref, eog_labels_ref,
                      total_ref, out_ref, *,
                      batch, kernel_mul, kernel_num, w1, w2, w3):
    c1 = _cross_entropy_body(clf_logits_ref[...], clf_labels_ref[...])
    c2 = _cross_entropy_body(eog_logits_ref[...], eog_labels_ref[...])
    c3 = _mmd_rbf_body(total_ref[...], batch, kernel_mul, kernel_num)
    out_ref[0] = w1 * c1 + w2 * c2 + w3 * c3


# ---------------------------------- wrapper ----------------------------------
def muti_loss(clf_pred, clf_label, eog_pred, eog_label, f1, f2,
              weight=(1.0, 1.0, 1.0), kernel_mul=2.0, kernel_num=5):
    # Stack MMD features in plain-JAX glue (source rows first, then target).
    total = jnp.concatenate([f1.astype(jnp.float32), f2.astype(jnp.float32)], axis=0)
    batch = f1.shape[0]
    w1, w2, w3 = (float(w) for w in weight)

    kern = functools.partial(
        _muti_loss_kernel, batch=batch, kernel_mul=kernel_mul,
        kernel_num=kernel_num, w1=w1, w2=w2, w3=w3)

    vmem = pl.BlockSpec(memory_space=pltpu.MemorySpace.VMEM)
    out = pl.pallas_call(
        kern,
        out_shape=jax.ShapeDtypeStruct((1,), jnp.float32),
        in_specs=[vmem, vmem, vmem, vmem, vmem],
        # Scalar result lives in SMEM -> no masked 1-lane VMEM store epilogue.
        out_specs=pl.BlockSpec(memory_space=pltpu.MemorySpace.SMEM),
    )(
        clf_pred.astype(jnp.float32),
        clf_label.astype(jnp.int32).reshape(-1, 1),
        eog_pred.astype(jnp.float32),
        eog_label.astype(jnp.int32).reshape(-1, 1),
        total,
    )
    return out[0]


# ------------------------------ pure-JAX reference ------------------------------
def _ref_ce(logits, labels):
    logits = logits.astype(jnp.float32)
    lse = jax.scipy.special.logsumexp(logits, axis=1)
    picked = jnp.take_along_axis(logits, labels[:, None].astype(jnp.int32), axis=1)[:, 0]
    return jnp.mean(lse - picked)


def _ref_mmd(f1, f2, kernel_mul=2.0, kernel_num=5):
    total = jnp.concatenate([f1, f2], axis=0).astype(jnp.float32)
    n = total.shape[0]
    b = f1.shape[0]
    l2 = jnp.sum((total[None, :, :] - total[:, None, :]) ** 2, axis=2)
    bw = jnp.sum(l2) / (n * n - n) / (kernel_mul ** (kernel_num // 2))
    k = sum(jnp.exp(-l2 / (bw * kernel_mul ** i)) for i in range(kernel_num))
    return (jnp.mean(k[:b, :b]) + jnp.mean(k[b:, b:])
            - jnp.mean(k[:b, b:]) - jnp.mean(k[b:, :b]))


if __name__ == "__main__":
    key = jax.random.PRNGKey(0)
    k1, k2, k3, k4, k5, k6 = jax.random.split(key, 6)

    N, C1, C2 = 8, 4, 5   # batch, clf classes, eog classes
    B, D = 8, 32          # MMD feature batch / dim

    clf_pred = jax.random.normal(k1, (N, C1), jnp.float32)
    clf_label = jax.random.randint(k2, (N,), 0, C1, jnp.int32)
    eog_pred = jax.random.normal(k3, (N, C2), jnp.float32)
    eog_label = jax.random.randint(k4, (N,), 0, C2, jnp.int32)
    f1 = jax.random.normal(k5, (B, D), jnp.float32)
    f2 = jax.random.normal(k6, (B, D), jnp.float32) + 0.5

    loss = muti_loss(clf_pred, clf_label, eog_pred, eog_label, f1, f2)
    jax.block_until_ready(loss)

    ref = (_ref_ce(clf_pred, clf_label) + _ref_ce(eog_pred, eog_label)
           + _ref_mmd(f1, f2))
    assert jnp.allclose(loss, ref, rtol=1e-4, atol=1e-4), (loss, ref)

    print("KERNEL_OK")
</pallas_src>

<mosaic_0001>
module attributes {stable_mosaic.version = 11 : i64} {
  func.func @_muti_loss_kernel(%arg0: memref<8x4xf32, #tpu.memory_space<vmem>>, %arg1: memref<8x1xi32, #tpu.memory_space<vmem>>, %arg2: memref<8x5xf32, #tpu.memory_space<vmem>>, %arg3: memref<8x1xi32, #tpu.memory_space<vmem>>, %arg4: memref<16x32xf32, #tpu.memory_space<vmem>>, %arg5: memref<1xf32, #tpu.memory_space<smem>>) attributes {dimension_semantics = [], scalar_prefetch = 0 : i64, scratch_operands = 0 : i64, tpu.core_type = #tpu.core_type<tc>} {
    %c0 = arith.constant 0 : index
    %c0_0 = arith.constant 0 : index
    %0 = vector.load %arg0[%c0, %c0_0] : memref<8x4xf32, #tpu.memory_space<vmem>>, vector<8x4xf32>
    %c0_1 = arith.constant 0 : index
    %c0_2 = arith.constant 0 : index
    %1 = vector.load %arg1[%c0_1, %c0_2] : memref<8x1xi32, #tpu.memory_space<vmem>>, vector<8x1xi32>
    %cst = arith.constant dense<0xFF800000> : vector<8xf32>
    %2 = vector.multi_reduction <maximumf>, %0, %cst [1] : vector<8x4xf32> to vector<8xf32>
    %3 = vector.shape_cast %2 : vector<8xf32> to vector<8x1xf32>
    %4 = vector.broadcast %3 : vector<8x1xf32> to vector<8x4xf32>
    %5 = arith.subf %0, %4 : vector<8x4xf32>
    %6 = math.exp %5 : vector<8x4xf32>
    %cst_3 = arith.constant dense<0.000000e+00> : vector<8xf32>
    %7 = vector.multi_reduction <add>, %6, %cst_3 [1] : vector<8x4xf32> to vector<8xf32>
    %8 = vector.shape_cast %7 : vector<8xf32> to vector<8x1xf32>
    %9 = math.log %8 : vector<8x1xf32>
    %10 = arith.addf %9, %3 : vector<8x1xf32>
    %11 = tpu.iota {dimensions = array<i32: 1>} : vector<8x4xi32>
    %12 = vector.broadcast %1 : vector<8x1xi32> to vector<8x4xi32>
    %13 = arith.cmpi eq, %11, %12 : vector<8x4xi32>
    %cst_4 = arith.constant 0.000000e+00 : f32
    %14 = vector.broadcast %cst_4 : f32 to vector<8x4xf32>
    %15 = arith.select %13, %0, %14 : vector<8x4xi1>, vector<8x4xf32>
    %cst_5 = arith.constant dense<0.000000e+00> : vector<8xf32>
    %16 = vector.multi_reduction <add>, %15, %cst_5 [1] : vector<8x4xf32> to vector<8xf32>
    %17 = vector.shape_cast %16 : vector<8xf32> to vector<8x1xf32>
    %18 = arith.subf %10, %17 : vector<8x1xf32>
    %19 = vector.shape_cast %18 : vector<8x1xf32> to vector<1x8x1xf32>
    %cst_6 = arith.constant dense<0.000000e+00> : vector<1xf32>
    %20 = vector.multi_reduction <add>, %19, %cst_6 [1, 2] : vector<1x8x1xf32> to vector<1xf32>
    %21 = vector.shape_cast %20 : vector<1xf32> to vector<1x1x1xf32>
    %22 = vector.extract %21[0, 0, 0] : f32 from vector<1x1x1xf32>
    %cst_7 = arith.constant 8.000000e+00 : f32
    %23 = arith.divf %22, %cst_7 : f32
    %c0_8 = arith.constant 0 : index
    %c0_9 = arith.constant 0 : index
    %24 = vector.load %arg2[%c0_8, %c0_9] : memref<8x5xf32, #tpu.memory_space<vmem>>, vector<8x5xf32>
    %c0_10 = arith.constant 0 : index
    %c0_11 = arith.constant 0 : index
    %25 = vector.load %arg3[%c0_10, %c0_11] : memref<8x1xi32, #tpu.memory_space<vmem>>, vector<8x1xi32>
    %cst_12 = arith.constant dense<0xFF800000> : vector<8xf32>
    %26 = vector.multi_reduction <maximumf>, %24, %cst_12 [1] : vector<8x5xf32> to vector<8xf32>
    %27 = vector.shape_cast %26 : vector<8xf32> to vector<8x1xf32>
    %28 = vector.broadcast %27 : vector<8x1xf32> to vector<8x5xf32>
    %29 = arith.subf %24, %28 : vector<8x5xf32>
    %30 = math.exp %29 : vector<8x5xf32>
    %cst_13 = arith.constant dense<0.000000e+00> : vector<8xf32>
    %31 = vector.multi_reduction <add>, %30, %cst_13 [1] : vector<8x5xf32> to vector<8xf32>
    %32 = vector.shape_cast %31 : vector<8xf32> to vector<8x1xf32>
    %33 = math.log %32 : vector<8x1xf32>
    %34 = arith.addf %33, %27 : vector<8x1xf32>
    %35 = tpu.iota {dimensions = array<i32: 1>} : vector<8x5xi32>
    %36 = vector.broadcast %25 : vector<8x1xi32> to vector<8x5xi32>
    %37 = arith.cmpi eq, %35, %36 : vector<8x5xi32>
    %cst_14 = arith.constant 0.000000e+00 : f32
    %38 = vector.broadcast %cst_14 : f32 to vector<8x5xf32>
    %39 = arith.select %37, %24, %38 : vector<8x5xi1>, vector<8x5xf32>
    %cst_15 = arith.constant dense<0.000000e+00> : vector<8xf32>
    %40 = vector.multi_reduction <add>, %39, %cst_15 [1] : vector<8x5xf32> to vector<8xf32>
    %41 = vector.shape_cast %40 : vector<8xf32> to vector<8x1xf32>
    %42 = arith.subf %34, %41 : vector<8x1xf32>
    %43 = vector.shape_cast %42 : vector<8x1xf32> to vector<1x8x1xf32>
    %cst_16 = arith.constant dense<0.000000e+00> : vector<1xf32>
    %44 = vector.multi_reduction <add>, %43, %cst_16 [1, 2] : vector<1x8x1xf32> to vector<1xf32>
    %45 = vector.shape_cast %44 : vector<1xf32> to vector<1x1x1xf32>
    %46 = vector.extract %45[0, 0, 0] : f32 from vector<1x1x1xf32>
    %cst_17 = arith.constant 8.000000e+00 : f32
    %47 = arith.divf %46, %cst_17 : f32
    %c0_18 = arith.constant 0 : index
    %c0_19 = arith.constant 0 : index
    %48 = vector.load %arg4[%c0_18, %c0_19] : memref<16x32xf32, #tpu.memory_space<vmem>>, vector<16x32xf32>
    %cst_20 = arith.constant dense<0.000000e+00> : vector<16x16xf32>
    %49 = tpu.matmul %48, %48, %cst_20 {dimension_numbers = #tpu.dot_dimension_numbers<[1], [1], [0], [0], [0, 0, 1, 0], [], []>} : vector<16x32xf32>, vector<16x32xf32>, vector<16x16xf32> -> vector<16x16xf32>
    %50 = tpu.iota {dimensions = array<i32: 0>} : vector<16x16xi32>
    %51 = tpu.iota {dimensions = array<i32: 1>} : vector<16x16xi32>
    %52 = arith.cmpi eq, %50, %51 : vector<16x16xi32>
    %cst_21 = arith.constant 0.000000e+00 : f32
    %53 = vector.broadcast %cst_21 : f32 to vector<16x16xf32>
    %54 = arith.select %52, %49, %53 : vector<16x16xi1>, vector<16x16xf32>
    %cst_22 = arith.constant dense<0.000000e+00> : vector<16xf32>
    %55 = vector.multi_reduction <add>, %54, %cst_22 [1] : vector<16x16xf32> to vector<16xf32>
    %56 = vector.shape_cast %55 : vector<16xf32> to vector<16x1xf32>
    %cst_23 = arith.constant dense<0.000000e+00> : vector<16xf32>
    %57 = vector.multi_reduction <add>, %54, %cst_23 [0] : vector<16x16xf32> to vector<16xf32>
    %58 = vector.shape_cast %57 : vector<16xf32> to vector<1x16xf32>
    %59 = vector.broadcast %56 : vector<16x1xf32> to vector<16x16xf32>
    %60 = vector.broadcast %58 : vector<1x16xf32> to vector<16x16xf32>
    %61 = arith.addf %59, %60 : vector<16x16xf32>
    %cst_24 = arith.constant 2.000000e+00 : f32
    %62 = vector.broadcast %cst_24 : f32 to vector<16x16xf32>
    %63 = arith.mulf %62, %49 : vector<16x16xf32>
    %64 = arith.subf %61, %63 : vector<16x16xf32>
    %cst_25 = arith.constant 0.000000e+00 : f32
    %65 = vector.broadcast %cst_25 : f32 to vector<16x16xf32>
    %66 = arith.maximumf %64, %65 : vector<16x16xf32>
    %67 = vector.shape_cast %66 : vector<16x16xf32> to vector<1x16x16xf32>
    %cst_26 = arith.constant dense<0.000000e+00> : vector<1xf32>
    %68 = vector.multi_reduction <add>, %67, %cst_26 [1, 2] : vector<1x16x16xf32> to vector<1xf32>
    %69 = vector.shape_cast %68 : vector<1xf32> to vector<1x1x1xf32>
    %70 = vector.extract %69[0, 0, 0] : f32 from vector<1x1x1xf32>
    %cst_27 = arith.constant 2.400000e+02 : f32
    %71 = arith.divf %70, %cst_27 : f32
    %cst_28 = arith.constant 4.000000e+00 : f32
    %72 = arith.divf %71, %cst_28 : f32
    %cst_29 = arith.constant 0.000000e+00 : f32
    %73 = vector.broadcast %cst_29 : f32 to vector<16x16xf32>
    %74 = arith.subf %73, %66 : vector<16x16xf32>
    %cst_30 = arith.constant 1.600000e+01 : f32
    %75 = arith.mulf %72, %cst_30 : f32
    %76 = vector.broadcast %75 : f32 to vector<16x16xf32>
    %77 = arith.divf %74, %76 : vector<16x16xf32>
    %78 = math.exp %77 : vector<16x16xf32>
    %79 = arith.mulf %78, %78 : vector<16x16xf32>
    %80 = arith.addf %78, %79 : vector<16x16xf32>
    %81 = arith.mulf %79, %79 : vector<16x16xf32>
    %82 = arith.addf %80, %81 : vector<16x16xf32>
    %83 = arith.mulf %81, %81 : vector<16x16xf32>
    %84 = arith.addf %82, %83 : vector<16x16xf32>
    %85 = arith.mulf %83, %83 : vector<16x16xf32>
    %86 = arith.addf %84, %85 : vector<16x16xf32>
    %c8_i32 = arith.constant 8 : i32
    %87 = vector.broadcast %c8_i32 : i32 to vector<16x16xi32>
    %88 = arith.cmpi slt, %50, %87 : vector<16x16xi32>
    %c8_i32_31 = arith.constant 8 : i32
    %89 = vector.broadcast %c8_i32_31 : i32 to vector<16x16xi32>
    %90 = arith.cmpi slt, %51, %89 : vector<16x16xi32>
    %91 = arith.xori %88, %90 : vector<16x16xi1>
    %cst_32 = arith.constant dense<true> : vector<16x16xi1>
    %92 = arith.xori %91, %cst_32 : vector<16x16xi1>
    %cst_33 = arith.constant 1.000000e+00 : f32
    %cst_34 = arith.constant -1.000000e+00 : f32
    %93 = vector.broadcast %cst_33 : f32 to vector<16x16xf32>
    %94 = vector.broadcast %cst_34 : f32 to vector<16x16xf32>
    %95 = arith.select %92, %93, %94 : vector<16x16xi1>, vector<16x16xf32>
    %96 = arith.mulf %95, %86 : vector<16x16xf32>
    %97 = vector.shape_cast %96 : vector<16x16xf32> to vector<1x16x16xf32>
    %cst_35 = arith.constant dense<0.000000e+00> : vector<1xf32>
    %98 = vector.multi_reduction <add>, %97, %cst_35 [1, 2] : vector<1x16x16xf32> to vector<1xf32>
    %99 = vector.shape_cast %98 : vector<1xf32> to vector<1x1x1xf32>
    %100 = vector.extract %99[0, 0, 0] : f32 from vector<1x1x1xf32>
    %cst_36 = arith.constant 6.400000e+01 : f32
    %101 = arith.divf %100, %cst_36 : f32
    %cst_37 = arith.constant 1.000000e+00 : f32
    %102 = arith.mulf %cst_37, %23 : f32
    %cst_38 = arith.constant 1.000000e+00 : f32
    %103 = arith.mulf %cst_38, %47 : f32
    %104 = arith.addf %102, %103 : f32
    %cst_39 = arith.constant 1.000000e+00 : f32
    %105 = arith.mulf %cst_39, %101 : f32
    %106 = arith.addf %104, %105 : f32
    %c0_40 = arith.constant 0 : index
    %107 = memref.load %arg5[%c0_40] : memref<1xf32, #tpu.memory_space<smem>>
    memref.store %106, %arg5[%c0_40] : memref<1xf32, #tpu.memory_space<smem>>
    return
  }
}

</mosaic_0001>

<bundles_post_ra>
// kernel: tpu_custom_call.1
= control target key start
LH: loop header
LB: loop body
LE: loop exit
PB: predicated region body
PF: predicated region fallthrough
CT: control target
= control target key end

     0   :  { %vm23_vm0 = vcmask 31744   ;;  %vm100_vm1 = vcmask 261120   ;;  %vm63_vm2 = vcmask 39936   ;;  %v360_v7 = vmov 0   ;;  %s462_s0 = inlined_call_operand.vmem [shape: f32[8,4], index: 0, kind: input, shape index: {}]   ;;  %s463_s1 = inlined_call_operand.vmem [shape: s32[8,1], index: 1, kind: input, shape index: {}]   ;;  %s464_s2 = inlined_call_operand.vmem [shape: f32[8,5], index: 2, kind: input, shape index: {}]   ;;  %s465_s3 = inlined_call_operand.vmem [shape: s32[8,1], index: 3, kind: input, shape index: {}]   ;;  %s466_s4 = inlined_call_operand.vmem [shape: f32[16,32], index: 4, kind: input, shape index: {}]   ;;  %s467_s5 = inlined_call_operand.hbm [shape: f32[1], index: 5, kind: output, shape index: {}]  }
   0x1   :  { %v21_v0 = vld [vmem:[%s462_s0] sm:$0xff]  ;;  %v99_v2 = vld [vmem:[%s466_s4 + $0x8] sm:$0xff]  ;;  %vm315_vm3 = vmpackc.low %vm100_vm1, %vm100_vm1  ;;  %332 = vset.pattern.permute.xlu1 %v360_v7 }
   0x2   :  { %v98_v1 = vld [vmem:[%s466_s4] sm:$0xff]  ;;  %v24_v3 = vsel %vm23_vm0, %v21_v0, -inf }
   0x3   :  { %v314_v4 = vpack.c.bf16 %v99_v2, %v98_v1  ;;  %v61_v5 = vld [vmem:[%s464_s2] sm:$0xff]  ;;  %311 = vmatprep.mubr.msk.f32.mxu0 %vm100_vm1, %v98_v1  ;;  %25 = vmax.xlane.f32.xlu0 %v24_v3 }
   0x4   :  { %v22_v6 = vld [vmem:[%s463_s1] sm:$0xff] }
   0x5   :  { %10 = vsyncpa [#allocation3], 0  ;;  %316 = vmatprep.subr.msk.bf16.mxu0 %vm315_vm3, %v314_v4  ;;  %v64_v8 = vsel %vm63_vm2, %v61_v5, -inf  ;;  %39 = vperm.xlu1 %332, %v22_v6   ;;  %v62_v9 = vld [vmem:[%s465_s3] sm:$0xff]  ;;  %v36_v20 = vlaneseq  ;;  %vm189_vm6 = vcmask 130048   ;;  %vm47_vm9 = vcmask 7168  }
   0x6   :  { %319 = vmatpush3.bf16.xpose.msk.msra.mxu0 %vm315_vm3, %v314_v4  ;;  %333 = vset.pattern.permute.xlu0 %v360_v7  ;;  %vm361_vm11 = vmmov 1   ;;  %s348_s14 = scalar_lea.hbm %s467_s5, 16 }
   0x7   :  { %65 = vmax.xlane.f32.xlu0 %v64_v8  ;;  %v183_v21 = vshrl.u32 %v36_v20, 7  ;;  %v426_v22 = vand.u32 127, %v36_v20  ;;  %p349_p0 = scmp.ne.s32.totalorder %s467_s5, %s348_s14  ;;  %p352_p1 = scmp.lt.u32.totalorder %s348_s14, %s467_s5 }
   0x9   :  { %77 = vperm.xlu1 %332, %v62_v9   ;;  %v184_v23 = vadd.s32 8, %v183_v21  ;;  %vm185_vm5 = vcmp.eq.s32.totalorder %v183_v21, %v426_v22  ;;  %vm258_vm10 = vcmp.lt.s32.totalorder %v426_v22, 8  ;;  %p354_p2 = pnand %p352_p1, %p349_p0 }
   0xa   :  { %vm259_vm12 = vmxor %vm361_vm11, %vm258_vm10 }
   0xb   :  { %vm186_vm4 = vcmp.eq.s32.totalorder %v184_v23, %v426_v22  ;;  %vm261_vm13 = vmxor %vm259_vm12, %vm361_vm11 }
   0xc   :  { %vm262_vm14 = vmxor %vm258_vm10, %vm361_vm11 }
   0xd   :  { %312 = vmatmul.mubr.msk.f32.vlgmr.msra.gmra.mrb[0].mxu0 %vm100_vm1, %v99_v2 }
  0x84   :  { %v40_v24 = vpop.permute.xlu1 %39 }
  0x85   :  { %vm41_vm7 = vcmp.eq.s32.totalorder %v426_v22, %v40_v24 }
  0x86   :  { %v42_v33 = vsel %vm41_vm7, %v21_v0, 0.0 }
  0x87   :  { %v43_v34 = vsel %vm23_vm0, %v42_v33, 0.0 }
  0x88   :  { %v78_v32 = vpop.permute.xlu1 %77 }
  0x89   :  { %vm79_vm8 = vcmp.eq.s32.totalorder %v426_v22, %v78_v32 }
  0x8a   :  { %v80_v35 = vsel %vm79_vm8, %v61_v5, 0.0 }
  0x8b   :  { %v81_v36 = vsel %vm63_vm2, %v80_v35, 0.0 }
  0x90   :  { %v418_v10 = vpop.xlane.xlu0 %25 }
  0x91   :  { %v27_v11 = vsub.f32 %v21_v0, %v418_v10 }
  0x93   :  { %v28_v12 = vmul.f32 1.442695, %v27_v11 }
  0x94   :  { %v421_v13 = vpop.xlane.xlu0 %65 }
  0x95   :  { %334 = vpow2.f32 %v28_v12  ;;  %v67_v14 = vsub.f32 %v61_v5, %v421_v13 }
  0x97   :  { %v68_v15 = vmul.f32 1.442695, %v67_v14 }
  0x99   :  { %336 = vpow2.f32 %v68_v15 }
  0x9f   :  { %v335_v16 = vpop.eup %334 }
  0xa0   :  { %v30_v17 = vsel %vm23_vm0, %v335_v16, 0.0 }
  0xa1   :  { %31 = vadd.xlane.f32.xlu0 %v30_v17 }
  0xa3   :  { %v337_v18 = vpop.eup %336 }
  0xa4   :  { %v70_v19 = vsel %vm63_vm2, %v337_v18, 0.0 }
  0xa5   :  { %71 = vadd.xlane.f32.xlu1 %v70_v19 }
  0xe0   :  { %v313_v25 = vpop.f32.mrb[0].mxu0 }
  0xe1   :  { %v173_v26 = vpop.f32.mrb[1].mxu0  ;;  %v188_v27 = vsel %vm186_vm4, %v313_v25, 0.0  ;;  %v206_v47 = vmul.f32 2.0, %v313_v25 }
  0xe2   :  { %v187_v28 = vsel %vm185_vm5, %v173_v26, 0.0  ;;  %v193_v29 = vsel %vm189_vm6, %v188_v27, 0.0  ;;  %v205_v53 = vmul.f32 2.0, %v173_v26 }
  0xe3   :  { %194 = vadd.xlane.f32.xlu0 %v193_v29  ;;  %v190_v30 = vsel %vm189_vm6, %v187_v28, 0.0 }
  0xe4   :  { %v196_v31 = vadd.f32 %v193_v29, %v190_v30 }
  0xe6   :  { %v197_v37 = vrot.slane %v196_v31, 4 }
  0xe7   :  { %191 = vadd.xlane.f32.xlu0 %v190_v30 }
  0xe8   :  { %v198_v38 = vadd.f32 %v197_v37, %v196_v31 }
  0xea   :  { %v199_v39 = vrot.slane %v198_v38, 2 }
  0xeb   :  { %44 = vadd.xlane.f32.xlu0 %v43_v34 }
  0xec   :  { %v200_v42 = vadd.f32 %v199_v39, %v198_v38 }
  0xee   :  { %v201_v43 = vrot.slane %v200_v42, 1 }
  0xef   :  { %82 = vadd.xlane.f32.xlu0 %v81_v36 }
  0xf0   :  { %v202_v44 = vadd.f32 %v201_v43, %v200_v42 }
 0x12e   :  { %v32_v40 = vpop.xlane.xlu0 %31 }
 0x12f   :  { %338 = vlog2.f32 %v32_v40 }
 0x132   :  { %v72_v41 = vpop.xlane.xlu1 %71 }
 0x133   :  { %340 = vlog2.f32 %v72_v41 }
 0x139   :  { %v339_v45 = vpop.eup %338 }
 0x13a   :  { %v34_v49 = vmul.f32 0.6931472, %v339_v45 }
 0x13c   :  { %v35_v58 = vadd.f32 %v34_v49, %v418_v10 }
 0x13d   :  { %v341_v51 = vpop.eup %340 }
 0x13e   :  { %v74_v55 = vmul.f32 0.6931472, %v341_v51 }
 0x140   :  { %v75_v63 = vadd.f32 %v74_v55, %v421_v13 }
 0x170   :  { %v195_v46 = vpop.xlane.xlu0 %194 }
 0x171   :  { %v204_v48 = vadd.f32 %v202_v44, %v195_v46 }
 0x173   :  { %v208_v50 = vsub.f32 %v204_v48, %v206_v47 }
 0x174   :  { %v192_v52 = vpop.xlane.xlu0 %191 }
 0x175   :  { %v203_v54 = vadd.f32 %v202_v44, %v192_v52  ;;  %v210_v56 = vmax.f32 %v208_v50, 0.0  ;;  %v362_v52 = vmov -1.0  }
 0x176   :  { %v264_v55 = vsel %vm262_vm14, 1.0, %v362_v52 }
 0x177   :  { %v207_v57 = vsub.f32 %v203_v54, %v205_v53  ;;  %v212_v1 = vsel %vm189_vm6, %v210_v56, 0.0  ;;  %v230_v29 = vsub.f32 0.0, %v210_v56  ;;  %v263_v53 = vsel %vm261_vm13, 1.0, %v362_v52 }
 0x178   :  { %v45_v59 = vpop.xlane.xlu0 %44 }
 0x179   :  { %v209_v60 = vmax.f32 %v207_v57, 0.0  ;;  %v46_v61 = vsub.f32 %v35_v58, %v45_v59 }
 0x17b   :  { %v48_v62 = vsel %vm47_vm9, %v46_v61, 0.0  ;;  %v211_v0 = vsel %vm189_vm6, %v209_v60, 0.0  ;;  %v229_v30 = vsub.f32 0.0, %v209_v60 }
 0x17c   :  { %49 = vadd.xlane.f32.xlu0 %v48_v62  ;;  %v83_v2 = vpop.xlane.xlu0 %82  ;;  %v213_v3 = vadd.f32 %v212_v1, %v211_v0 }
 0x17d   :  { %v84_v4 = vsub.f32 %v75_v63, %v83_v2 }
 0x17f   :  { %v85_v5 = vsel %vm47_vm9, %v84_v4, 0.0 }
 0x180   :  { %86 = vadd.xlane.f32.xlu0 %v85_v5 }
 0x184   :  { %214 = vadd.xlane.f32.xlu0 %v213_v3 }
 0x209   :  { %v50_v6 = vpop.xlane.xlu0 %49 }
 0x20a   :  { %v51_v7 = vrot.slane %v50_v6, 4 }
 0x20c   :  { %v52_v8 = vadd.f32 %v51_v7, %v50_v6 }
 0x20d   :  { %v87_v9 = vpop.xlane.xlu0 %86 }
 0x20e   :  { %v53_v10 = vrot.slane %v52_v8, 2  ;;  %v88_v11 = vrot.slane %v87_v9, 4 }
 0x210   :  { %v89_v12 = vadd.f32 %v88_v11, %v87_v9  ;;  %v54_v14 = vadd.f32 %v53_v10, %v52_v8 }
 0x211   :  { %v215_v13 = vpop.xlane.xlu0 %214 }
 0x212   :  { %v90_v15 = vrot.slane %v89_v12, 2  ;;  %v216_v16 = vrot.slane %v215_v13, 4  ;;  %v55_v17 = vrot.slane %v54_v14, 1 }
 0x214   :  { %v217_v18 = vadd.f32 %v216_v16, %v215_v13  ;;  %v56_v19 = vadd.f32 %v55_v17, %v54_v14  ;;  %v91_v20 = vadd.f32 %v90_v15, %v89_v12 }
 0x216   :  { %v218_v21 = vrot.slane %v217_v18, 2  ;;  %320 = vpush %v56_v19  ;;  %v92_v23 = vrot.slane %v91_v20, 1 }
 0x218   :  { %v93_v24 = vadd.f32 %v92_v23, %v91_v20  ;;  %v219_v25 = vadd.f32 %v218_v21, %v217_v18 }
 0x21a   :  { %322 = vpush %v93_v24  ;;  %v220_v26 = vrot.slane %v219_v25, 1 }
 0x21c   :  { %v221_v27 = vadd.f32 %v220_v26, %v219_v25 }
 0x21e   :  { %324 = vpush %v221_v27 }
 0x247   :  { %s321_s1 = spop %320 }
 0x248   :  { %s60_s2 = smul.f32 0.125, %s321_s1 }
 0x24b   :  { %s323_s3 = spop %322 }
 0x24c   :  { %s97_s28 = smul.f32 0.125, %s323_s3 }
 0x24e   :  { %s440_s29 = sadd.f32 %s97_s28, %s60_s2 }
 0x24f   :  { %s325_s30 = spop %324 }
 0x250   :  { %s225_s6 = smul.f32 0.004166667, %s325_s30 }
 0x252   :  { %s228_s7 = smul.f32 0.25, %s225_s6 }
 0x254   :  { %s231_s8 = smul.f32 16.0, %s228_s7 }
 0x256   :  { %v232_v28 = vstv %s231_s8 }
 0x257   :  { %342 = vrcp.f32 %v232_v28 }
 0x261   :  { %v343_v31 = vpop.eup %342 }
 0x262   :  { %v234_v32 = vmul.f32 %v343_v31, %v229_v30  ;;  %v235_v33 = vmul.f32 %v343_v31, %v230_v29 }
 0x264   :  { %v236_v34 = vmul.f32 1.442695, %v234_v32  ;;  %v238_v35 = vmul.f32 1.442695, %v235_v33 }
 0x266   :  { %344 = vpow2.f32 %v236_v34 }
 0x267   :  { %346 = vpow2.f32 %v238_v35 }
 0x270   :  { %v345_v36 = vpop.eup %344 }
 0x271   :  { %v347_v37 = vpop.eup %346  ;;  %v240_v38 = vmul.f32 %v345_v36, %v345_v36 }
 0x272   :  { %v241_v39 = vmul.f32 %v347_v37, %v347_v37 }
 0x273   :  { %v242_v40 = vadd.f32 %v345_v36, %v240_v38  ;;  %v244_v41 = vmul.f32 %v240_v38, %v240_v38 }
 0x274   :  { %v243_v42 = vadd.f32 %v347_v37, %v241_v39  ;;  %v245_v43 = vmul.f32 %v241_v39, %v241_v39 }
 0x275   :  { %v246_v44 = vadd.f32 %v244_v41, %v242_v40  ;;  %v248_v45 = vmul.f32 %v244_v41, %v244_v41 }
 0x276   :  { %v247_v46 = vadd.f32 %v245_v43, %v243_v42  ;;  %v249_v47 = vmul.f32 %v245_v43, %v245_v43 }
 0x277   :  { %v250_v48 = vadd.f32 %v248_v45, %v246_v44  ;;  %v252_v49 = vmul.f32 %v248_v45, %v248_v45 }
 0x278   :  { %v251_v50 = vadd.f32 %v249_v47, %v247_v46  ;;  %v253_v51 = vmul.f32 %v249_v47, %v249_v47 }
 0x279   :  { %v254_v54 = vadd.f32 %v252_v49, %v250_v48 }
 0x27a   :  { %v255_v56 = vadd.f32 %v253_v51, %v251_v50 }
 0x27b   :  { %v265_v57 = vmul.f32 %v263_v53, %v254_v54 }
 0x27c   :  { %v266_v58 = vmul.f32 %v264_v55, %v255_v56 }
 0x27d   :  { %v267_v59 = vsel %vm189_vm6, %v265_v57, 0.0 }
 0x27e   :  { %v268_v60 = vsel %vm189_vm6, %v266_v58, 0.0 }
 0x27f   :  { %v269_v61 = vadd.f32 %v268_v60, %v267_v59 }
 0x281   :  { %270 = vadd.xlane.f32.xlu0 %v269_v61 }
 0x30e   :  { %v271_v22 = vpop.xlane.xlu0 %270 }
 0x30f   :  { %v272_v62 = vrot.slane %v271_v22, 4 }
 0x311   :  { %v273_v63 = vadd.f32 %v272_v62, %v271_v22 }
 0x313   :  { %v274_v0 = vrot.slane %v273_v63, 2 }
 0x315   :  { %v275_v1 = vadd.f32 %v274_v0, %v273_v63 }
 0x317   :  { %v276_v2 = vrot.slane %v275_v1, 1 }
 0x319   :  { %v277_v3 = vadd.f32 %v276_v2, %v275_v1 }
 0x31b   :  { %326 = vpush %v277_v3 }
 0x34c   :  { %s327_s9 = spop %326 }
 0x34d   :  { %s281_s10 = smul.f32 0.015625, %s327_s9 }
 0x34f   :  { %s283_s11 = sadd.f32 %s440_s29, %s281_s10 }
 0x351   :  { %285 = sst [smem:[#allocation2]] %s283_s11 }
 0x352   :  { %357 = shalt.err (!%p354_p2)
}
 0x353   :  { %s363_s19 = smov [#allocation2]  }
 0x354   :  { %293 = dma.smem_to_hbm %s363_s19, 16, %s467_s5, [#allocation3]  }
 0x355   :  { %358 = dma.done.wait [#allocation3], 16  }
 0x356   :  { %359 = vsyncadd [#allocation3], 4294967280 }
 0x357   :  { %297 = sfence }
 0x358   :  { %298 = vsyncpa [#allocation3], 1 }

</bundles_post_ra>
